<compile_context>
chip_gen: v5e
topology: v5e:2x2
jax: 0.10.0
libtpu: 0.0.40
codegen_flags: <defaults>
</compile_context>

<pallas_src>
import functools

import jax
import jax.numpy as jnp
from jax import lax
from jax.experimental import pallas as pl
from jax.experimental.pallas import tpu as pltpu


def _round_up(x, m):
    return (x + m - 1) // m * m


def cbow_kernel(tok_ref, emb_ref, w_ref, b_ref, out_ref, acc_ref, *, num_labels):
    """One grid step computes log-probs for a TILE_B-sized tile of bags.

    tok_ref : SMEM int32[B, S]        (scalar-prefetched token ids, all bags)
    emb_ref : VMEM f32[V, E_pad]      (embedding table, resident across grid)
    w_ref   : VMEM f32[L_pad, E_pad]  (linear weight, native (L, E) layout)
    b_ref   : VMEM f32[1, L_pad]
    out_ref : VMEM f32[TILE_B, L_pad]
    acc_ref : VMEM f32[TILE_B, E_pad] (scratch: per-bag embedding sums)
    """
    i = pl.program_id(0)
    tile_b, e_pad = acc_ref.shape
    seq_len = tok_ref.shape[1]

    # --- embedding-bag: direct row gather + sum (no one-hot, no O(V*E) read).
    for b in range(tile_b):                       # static unroll over the tile
        row_idx = i * tile_b + b

        def body(s, acc):
            tok = tok_ref[row_idx, s]
            # NOTE: like nn.Embedding, token ids are assumed in-range; Pallas
            # performs no bounds check on VMEM row loads.
            return acc + emb_ref[pl.ds(tok, 1), :]

        acc_ref[b:b + 1, :] = lax.fori_loop(
            0, seq_len, body, jnp.zeros((1, e_pad), jnp.float32), unroll=True)

    # --- linear layer on the MXU: (TILE_B, E_pad) x (L_pad, E_pad)^T
    summed = acc_ref[...]
    logits = lax.dot_general(
        summed, w_ref[...],
        dimension_numbers=(((1,), (1,)), ((), ())),
        preferred_element_type=jnp.float32) + b_ref[...]

    # --- mask padded label columns, then numerically stable log-softmax.
    col = lax.broadcasted_iota(jnp.int32, logits.shape, 1)
    logits = jnp.where(col < num_labels, logits, -1e30)
    m = jnp.max(logits, axis=-1, keepdims=True)
    z = logits - m
    lse = jnp.log(jnp.sum(jnp.exp(z), axis=-1, keepdims=True))
    out_ref[...] = z - lse


def make_cbow_params(emb_table, lin_w, lin_b):
    """Pad parameters to lane-dense shapes ONCE (outside the per-call path)."""
    _, e = emb_table.shape
    l = lin_w.shape[0]
    e_pad = _round_up(e, 128)
    l_pad = _round_up(l, 128)
    emb_p = jnp.pad(emb_table.astype(jnp.float32), ((0, 0), (0, e_pad - e)))
    w_p = jnp.pad(lin_w.astype(jnp.float32), ((0, l_pad - l), (0, e_pad - e)))
    b_p = jnp.pad(lin_b.astype(jnp.float32), (0, l_pad - l)).reshape(1, l_pad)
    return emb_p, w_p, b_p


def cbow_forward_batched(tokens, emb_p, w_p, b_p, num_labels, tile_b=8):
    """tokens: int32[B, S] with B % tile_b == 0 -> log-probs f32[B, num_labels]."""
    batch, _ = tokens.shape
    assert batch % tile_b == 0
    v, e_pad = emb_p.shape
    l_pad = w_p.shape[0]

    kernel = functools.partial(cbow_kernel, num_labels=num_labels)
    out = pl.pallas_call(
        kernel,
        out_shape=jax.ShapeDtypeStruct((batch, l_pad), jnp.float32),
        grid_spec=pltpu.PrefetchScalarGridSpec(
            num_scalar_prefetch=1,                    # tokens -> SMEM
            grid=(batch // tile_b,),
            in_specs=[
                # Whole (small) table resident in VMEM; constant block index so
                # it is DMA'd once and reused across grid steps.
                # TODO(synk): for large vocabularies / v7x (64 MiB VMEM) keep
                # the table in HBM (memory_space=pl.ANY) and DMA touched rows.
                pl.BlockSpec((v, e_pad), lambda i, tok: (0, 0)),
                pl.BlockSpec((l_pad, e_pad), lambda i, tok: (0, 0)),
                pl.BlockSpec((1, l_pad), lambda i, tok: (0, 0)),
            ],
            out_specs=pl.BlockSpec((tile_b, l_pad), lambda i, tok: (i, 0)),
            scratch_shapes=[pltpu.VMEM((tile_b, e_pad), jnp.float32)],
        ),
        compiler_params=pltpu.CompilerParams(
            dimension_semantics=("parallel",)),
    )(tokens.astype(jnp.int32), emb_p, w_p, b_p)
    return out[:, :num_labels]


def cbow_forward(tokens_1d, emb_p, w_p, b_p, num_labels, tile_b=8):
    """Exact CBOW.forward semantics: one bag int[S] -> log-probs f32[L]."""
    seq = tokens_1d.shape[0]
    toks = jnp.zeros((tile_b, seq), jnp.int32).at[0].set(
        tokens_1d.astype(jnp.int32))
    out = cbow_forward_batched(toks, emb_p, w_p, b_p, num_labels, tile_b=tile_b)
    return out[0]


def cbow_reference(tokens, emb_table, lin_w, lin_b):
    summed = jnp.sum(emb_table[tokens], axis=0)
    logits = summed @ lin_w.T + lin_b
    return jax.nn.log_softmax(logits, axis=0)


if __name__ == "__main__":
    vocab_size = 32
    embedding_size = 32
    num_labels = 8
    seq_len = 8
    batch = 8            # number of bags; multiple of tile_b=8

    key = jax.random.PRNGKey(0)
    k_tok, k_emb, k_w, k_b = jax.random.split(key, 4)

    # Deterministic parameters mirroring nn.Embedding / nn.Linear defaults.
    emb_table = jax.random.normal(k_emb, (vocab_size, embedding_size),
                                  dtype=jnp.float32)
    bound = 1.0 / (embedding_size ** 0.5)
    lin_w = jax.random.uniform(k_w, (num_labels, embedding_size),
                               minval=-bound, maxval=bound, dtype=jnp.float32)
    lin_b = jax.random.uniform(k_b, (num_labels,),
                               minval=-bound, maxval=bound, dtype=jnp.float32)

    tokens = jax.random.randint(k_tok, (batch, seq_len), 0, vocab_size,
                                dtype=jnp.int32)

    # One-time padding of parameters (not part of the per-call hot path).
    emb_p, w_p, b_p = make_cbow_params(emb_table, lin_w, lin_b)

    # Batched path: (B, S) -> (B, L).
    log_probs = cbow_forward_batched(tokens, emb_p, w_p, b_p, num_labels)
    jax.block_until_ready(log_probs)
    ref = jax.vmap(lambda t: cbow_reference(t, emb_table, lin_w, lin_b))(tokens)
    assert log_probs.shape == (batch, num_labels)
    assert jnp.allclose(log_probs, ref, atol=1e-5, rtol=1e-5)

    # Single-bag path, matching the PyTorch module's forward exactly.
    single = cbow_forward(tokens[0], emb_p, w_p, b_p, num_labels)
    jax.block_until_ready(single)
    assert single.shape == (num_labels,)
    assert jnp.allclose(single, ref[0], atol=1e-5, rtol=1e-5)

    print("KERNEL_OK")
</pallas_src>

<mosaic_0001>
module attributes {stable_mosaic.version = 11 : i64} {
  func.func @cbow_kernel(%arg0: i32, %arg1: memref<8x8xi32, #tpu.memory_space<smem>>, %arg2: memref<32x128xf32, #tpu.memory_space<vmem>>, %arg3: memref<128x128xf32, #tpu.memory_space<vmem>>, %arg4: memref<1x128xf32, #tpu.memory_space<vmem>>, %arg5: memref<8x128xf32, #tpu.memory_space<vmem>>, %arg6: memref<8x128xf32, #tpu.memory_space<vmem>>) attributes {dimension_semantics = [#tpu.dimension_semantics<parallel>], iteration_bounds = array<i64: 1>, scalar_prefetch = 1 : i64, scratch_operands = 1 : i64, tpu.core_type = #tpu.core_type<tc>, window_params = [{pipeline_mode = #tpu.pipeline_mode<synchronous>, transform_indices = @transform_0, window_bounds = array<i64: 32, 128>}, {pipeline_mode = #tpu.pipeline_mode<synchronous>, transform_indices = @transform_1, window_bounds = array<i64: 128, 128>}, {pipeline_mode = #tpu.pipeline_mode<synchronous>, transform_indices = @transform_2, window_bounds = array<i64: 1, 128>}, {transform_indices = @transform_3, window_bounds = array<i64: 8, 128>}]} {
    %c8_i32 = arith.constant 8 : i32
    %0 = arith.muli %arg0, %c8_i32 : i32
    %c0_i32 = arith.constant 0 : i32
    %1 = arith.addi %0, %c0_i32 : i32
    %cst = arith.constant 0.000000e+00 : f32
    %2 = vector.broadcast %cst : f32 to vector<1x128xf32>
    %c0_i32_0 = arith.constant 0 : i32
    %3 = arith.index_cast %1 : i32 to index
    %4 = arith.index_cast %c0_i32_0 : i32 to index
    %5 = memref.load %arg1[%3, %4] : memref<8x8xi32, #tpu.memory_space<smem>>
    %6 = arith.index_cast %5 : i32 to index
    %c0 = arith.constant 0 : index
    %7 = vector.load %arg2[%6, %c0] : memref<32x128xf32, #tpu.memory_space<vmem>>, vector<1x128xf32>
    %8 = arith.addf %2, %7 : vector<1x128xf32>
    %c1_i32 = arith.constant 1 : i32
    %9 = arith.index_cast %1 : i32 to index
    %10 = arith.index_cast %c1_i32 : i32 to index
    %11 = memref.load %arg1[%9, %10] : memref<8x8xi32, #tpu.memory_space<smem>>
    %12 = arith.index_cast %11 : i32 to index
    %c0_1 = arith.constant 0 : index
    %13 = vector.load %arg2[%12, %c0_1] : memref<32x128xf32, #tpu.memory_space<vmem>>, vector<1x128xf32>
    %14 = arith.addf %8, %13 : vector<1x128xf32>
    %c2_i32 = arith.constant 2 : i32
    %15 = arith.index_cast %1 : i32 to index
    %16 = arith.index_cast %c2_i32 : i32 to index
    %17 = memref.load %arg1[%15, %16] : memref<8x8xi32, #tpu.memory_space<smem>>
    %18 = arith.index_cast %17 : i32 to index
    %c0_2 = arith.constant 0 : index
    %19 = vector.load %arg2[%18, %c0_2] : memref<32x128xf32, #tpu.memory_space<vmem>>, vector<1x128xf32>
    %20 = arith.addf %14, %19 : vector<1x128xf32>
    %c3_i32 = arith.constant 3 : i32
    %21 = arith.index_cast %1 : i32 to index
    %22 = arith.index_cast %c3_i32 : i32 to index
    %23 = memref.load %arg1[%21, %22] : memref<8x8xi32, #tpu.memory_space<smem>>
    %24 = arith.index_cast %23 : i32 to index
    %c0_3 = arith.constant 0 : index
    %25 = vector.load %arg2[%24, %c0_3] : memref<32x128xf32, #tpu.memory_space<vmem>>, vector<1x128xf32>
    %26 = arith.addf %20, %25 : vector<1x128xf32>
    %c4_i32 = arith.constant 4 : i32
    %27 = arith.index_cast %1 : i32 to index
    %28 = arith.index_cast %c4_i32 : i32 to index
    %29 = memref.load %arg1[%27, %28] : memref<8x8xi32, #tpu.memory_space<smem>>
    %30 = arith.index_cast %29 : i32 to index
    %c0_4 = arith.constant 0 : index
    %31 = vector.load %arg2[%30, %c0_4] : memref<32x128xf32, #tpu.memory_space<vmem>>, vector<1x128xf32>
    %32 = arith.addf %26, %31 : vector<1x128xf32>
    %c5_i32 = arith.constant 5 : i32
    %33 = arith.index_cast %1 : i32 to index
    %34 = arith.index_cast %c5_i32 : i32 to index
    %35 = memref.load %arg1[%33, %34] : memref<8x8xi32, #tpu.memory_space<smem>>
    %36 = arith.index_cast %35 : i32 to index
    %c0_5 = arith.constant 0 : index
    %37 = vector.load %arg2[%36, %c0_5] : memref<32x128xf32, #tpu.memory_space<vmem>>, vector<1x128xf32>
    %38 = arith.addf %32, %37 : vector<1x128xf32>
    %c6_i32 = arith.constant 6 : i32
    %39 = arith.index_cast %1 : i32 to index
    %40 = arith.index_cast %c6_i32 : i32 to index
    %41 = memref.load %arg1[%39, %40] : memref<8x8xi32, #tpu.memory_space<smem>>
    %42 = arith.index_cast %41 : i32 to index
    %c0_6 = arith.constant 0 : index
    %43 = vector.load %arg2[%42, %c0_6] : memref<32x128xf32, #tpu.memory_space<vmem>>, vector<1x128xf32>
    %44 = arith.addf %38, %43 : vector<1x128xf32>
    %c7_i32 = arith.constant 7 : i32
    %45 = arith.index_cast %1 : i32 to index
    %46 = arith.index_cast %c7_i32 : i32 to index
    %47 = memref.load %arg1[%45, %46] : memref<8x8xi32, #tpu.memory_space<smem>>
    %48 = arith.index_cast %47 : i32 to index
    %c0_7 = arith.constant 0 : index
    %49 = vector.load %arg2[%48, %c0_7] : memref<32x128xf32, #tpu.memory_space<vmem>>, vector<1x128xf32>
    %50 = arith.addf %44, %49 : vector<1x128xf32>
    %c8_i32_8 = arith.constant 8 : i32
    %c0_9 = arith.constant 0 : index
    %c0_10 = arith.constant 0 : index
    %51 = vector.load %arg6[%c0_9, %c0_10] : memref<8x128xf32, #tpu.memory_space<vmem>>, vector<1x128xf32>
    tpu.vector_store %arg6[%c0_9, %c0_10], %50 {strides = array<i32>} : memref<8x128xf32, #tpu.memory_space<vmem>>, vector<1x128xf32>,
    %c8_i32_11 = arith.constant 8 : i32
    %52 = arith.muli %arg0, %c8_i32_11 : i32
    %c1_i32_12 = arith.constant 1 : i32
    %53 = arith.addi %52, %c1_i32_12 : i32
    %cst_13 = arith.constant 0.000000e+00 : f32
    %54 = vector.broadcast %cst_13 : f32 to vector<1x128xf32>
    %c0_i32_14 = arith.constant 0 : i32
    %55 = arith.index_cast %53 : i32 to index
    %56 = arith.index_cast %c0_i32_14 : i32 to index
    %57 = memref.load %arg1[%55, %56] : memref<8x8xi32, #tpu.memory_space<smem>>
    %58 = arith.index_cast %57 : i32 to index
    %c0_15 = arith.constant 0 : index
    %59 = vector.load %arg2[%58, %c0_15] : memref<32x128xf32, #tpu.memory_space<vmem>>, vector<1x128xf32>
    %60 = arith.addf %54, %59 : vector<1x128xf32>
    %c1_i32_16 = arith.constant 1 : i32
    %61 = arith.index_cast %53 : i32 to index
    %62 = arith.index_cast %c1_i32_16 : i32 to index
    %63 = memref.load %arg1[%61, %62] : memref<8x8xi32, #tpu.memory_space<smem>>
    %64 = arith.index_cast %63 : i32 to index
    %c0_17 = arith.constant 0 : index
    %65 = vector.load %arg2[%64, %c0_17] : memref<32x128xf32, #tpu.memory_space<vmem>>, vector<1x128xf32>
    %66 = arith.addf %60, %65 : vector<1x128xf32>
    %c2_i32_18 = arith.constant 2 : i32
    %67 = arith.index_cast %53 : i32 to index
    %68 = arith.index_cast %c2_i32_18 : i32 to index
    %69 = memref.load %arg1[%67, %68] : memref<8x8xi32, #tpu.memory_space<smem>>
    %70 = arith.index_cast %69 : i32 to index
    %c0_19 = arith.constant 0 : index
    %71 = vector.load %arg2[%70, %c0_19] : memref<32x128xf32, #tpu.memory_space<vmem>>, vector<1x128xf32>
    %72 = arith.addf %66, %71 : vector<1x128xf32>
    %c3_i32_20 = arith.constant 3 : i32
    %73 = arith.index_cast %53 : i32 to index
    %74 = arith.index_cast %c3_i32_20 : i32 to index
    %75 = memref.load %arg1[%73, %74] : memref<8x8xi32, #tpu.memory_space<smem>>
    %76 = arith.index_cast %75 : i32 to index
    %c0_21 = arith.constant 0 : index
    %77 = vector.load %arg2[%76, %c0_21] : memref<32x128xf32, #tpu.memory_space<vmem>>, vector<1x128xf32>
    %78 = arith.addf %72, %77 : vector<1x128xf32>
    %c4_i32_22 = arith.constant 4 : i32
    %79 = arith.index_cast %53 : i32 to index
    %80 = arith.index_cast %c4_i32_22 : i32 to index
    %81 = memref.load %arg1[%79, %80] : memref<8x8xi32, #tpu.memory_space<smem>>
    %82 = arith.index_cast %81 : i32 to index
    %c0_23 = arith.constant 0 : index
    %83 = vector.load %arg2[%82, %c0_23] : memref<32x128xf32, #tpu.memory_space<vmem>>, vector<1x128xf32>
    %84 = arith.addf %78, %83 : vector<1x128xf32>
    %c5_i32_24 = arith.constant 5 : i32
    %85 = arith.index_cast %53 : i32 to index
    %86 = arith.index_cast %c5_i32_24 : i32 to index
    %87 = memref.load %arg1[%85, %86] : memref<8x8xi32, #tpu.memory_space<smem>>
    %88 = arith.index_cast %87 : i32 to index
    %c0_25 = arith.constant 0 : index
    %89 = vector.load %arg2[%88, %c0_25] : memref<32x128xf32, #tpu.memory_space<vmem>>, vector<1x128xf32>
    %90 = arith.addf %84, %89 : vector<1x128xf32>
    %c6_i32_26 = arith.constant 6 : i32
    %91 = arith.index_cast %53 : i32 to index
    %92 = arith.index_cast %c6_i32_26 : i32 to index
    %93 = memref.load %arg1[%91, %92] : memref<8x8xi32, #tpu.memory_space<smem>>
    %94 = arith.index_cast %93 : i32 to index
    %c0_27 = arith.constant 0 : index
    %95 = vector.load %arg2[%94, %c0_27] : memref<32x128xf32, #tpu.memory_space<vmem>>, vector<1x128xf32>
    %96 = arith.addf %90, %95 : vector<1x128xf32>
    %c7_i32_28 = arith.constant 7 : i32
    %97 = arith.index_cast %53 : i32 to index
    %98 = arith.index_cast %c7_i32_28 : i32 to index
    %99 = memref.load %arg1[%97, %98] : memref<8x8xi32, #tpu.memory_space<smem>>
    %100 = arith.index_cast %99 : i32 to index
    %c0_29 = arith.constant 0 : index
    %101 = vector.load %arg2[%100, %c0_29] : memref<32x128xf32, #tpu.memory_space<vmem>>, vector<1x128xf32>
    %102 = arith.addf %96, %101 : vector<1x128xf32>
    %c8_i32_30 = arith.constant 8 : i32
    %c1 = arith.constant 1 : index
    %c0_31 = arith.constant 0 : index
    %103 = vector.load %arg6[%c1, %c0_31] : memref<8x128xf32, #tpu.memory_space<vmem>>, vector<1x128xf32>
    tpu.vector_store %arg6[%c1, %c0_31], %102 {strides = array<i32>} : memref<8x128xf32, #tpu.memory_space<vmem>>, vector<1x128xf32>,
    %c8_i32_32 = arith.constant 8 : i32
    %104 = arith.muli %arg0, %c8_i32_32 : i32
    %c2_i32_33 = arith.constant 2 : i32
    %105 = arith.addi %104, %c2_i32_33 : i32
    %cst_34 = arith.constant 0.000000e+00 : f32
    %106 = vector.broadcast %cst_34 : f32 to vector<1x128xf32>
    %c0_i32_35 = arith.constant 0 : i32
    %107 = arith.index_cast %105 : i32 to index
    %108 = arith.index_cast %c0_i32_35 : i32 to index
    %109 = memref.load %arg1[%107, %108] : memref<8x8xi32, #tpu.memory_space<smem>>
    %110 = arith.index_cast %109 : i32 to index
    %c0_36 = arith.constant 0 : index
    %111 = vector.load %arg2[%110, %c0_36] : memref<32x128xf32, #tpu.memory_space<vmem>>, vector<1x128xf32>
    %112 = arith.addf %106, %111 : vector<1x128xf32>
    %c1_i32_37 = arith.constant 1 : i32
    %113 = arith.index_cast %105 : i32 to index
    %114 = arith.index_cast %c1_i32_37 : i32 to index
    %115 = memref.load %arg1[%113, %114] : memref<8x8xi32, #tpu.memory_space<smem>>
    %116 = arith.index_cast %115 : i32 to index
    %c0_38 = arith.constant 0 : index
    %117 = vector.load %arg2[%116, %c0_38] : memref<32x128xf32, #tpu.memory_space<vmem>>, vector<1x128xf32>
    %118 = arith.addf %112, %117 : vector<1x128xf32>
    %c2_i32_39 = arith.constant 2 : i32
    %119 = arith.index_cast %105 : i32 to index
    %120 = arith.index_cast %c2_i32_39 : i32 to index
    %121 = memref.load %arg1[%119, %120] : memref<8x8xi32, #tpu.memory_space<smem>>
    %122 = arith.index_cast %121 : i32 to index
    %c0_40 = arith.constant 0 : index
    %123 = vector.load %arg2[%122, %c0_40] : memref<32x128xf32, #tpu.memory_space<vmem>>, vector<1x128xf32>
    %124 = arith.addf %118, %123 : vector<1x128xf32>
    %c3_i32_41 = arith.constant 3 : i32
    %125 = arith.index_cast %105 : i32 to index
    %126 = arith.index_cast %c3_i32_41 : i32 to index
    %127 = memref.load %arg1[%125, %126] : memref<8x8xi32, #tpu.memory_space<smem>>
    %128 = arith.index_cast %127 : i32 to index
    %c0_42 = arith.constant 0 : index
    %129 = vector.load %arg2[%128, %c0_42] : memref<32x128xf32, #tpu.memory_space<vmem>>, vector<1x128xf32>
    %130 = arith.addf %124, %129 : vector<1x128xf32>
    %c4_i32_43 = arith.constant 4 : i32
    %131 = arith.index_cast %105 : i32 to index
    %132 = arith.index_cast %c4_i32_43 : i32 to index
    %133 = memref.load %arg1[%131, %132] : memref<8x8xi32, #tpu.memory_space<smem>>
    %134 = arith.index_cast %133 : i32 to index
    %c0_44 = arith.constant 0 : index
    %135 = vector.load %arg2[%134, %c0_44] : memref<32x128xf32, #tpu.memory_space<vmem>>, vector<1x128xf32>
    %136 = arith.addf %130, %135 : vector<1x128xf32>
    %c5_i32_45 = arith.constant 5 : i32
    %137 = arith.index_cast %105 : i32 to index
    %138 = arith.index_cast %c5_i32_45 : i32 to index
    %139 = memref.load %arg1[%137, %138] : memref<8x8xi32, #tpu.memory_space<smem>>
    %140 = arith.index_cast %139 : i32 to index
    %c0_46 = arith.constant 0 : index
    %141 = vector.load %arg2[%140, %c0_46] : memref<32x128xf32, #tpu.memory_space<vmem>>, vector<1x128xf32>
    %142 = arith.addf %136, %141 : vector<1x128xf32>
    %c6_i32_47 = arith.constant 6 : i32
    %143 = arith.index_cast %105 : i32 to index
    %144 = arith.index_cast %c6_i32_47 : i32 to index
    %145 = memref.load %arg1[%143, %144] : memref<8x8xi32, #tpu.memory_space<smem>>
    %146 = arith.index_cast %145 : i32 to index
    %c0_48 = arith.constant 0 : index
    %147 = vector.load %arg2[%146, %c0_48] : memref<32x128xf32, #tpu.memory_space<vmem>>, vector<1x128xf32>
    %148 = arith.addf %142, %147 : vector<1x128xf32>
    %c7_i32_49 = arith.constant 7 : i32
    %149 = arith.index_cast %105 : i32 to index
    %150 = arith.index_cast %c7_i32_49 : i32 to index
    %151 = memref.load %arg1[%149, %150] : memref<8x8xi32, #tpu.memory_space<smem>>
    %152 = arith.index_cast %151 : i32 to index
    %c0_50 = arith.constant 0 : index
    %153 = vector.load %arg2[%152, %c0_50] : memref<32x128xf32, #tpu.memory_space<vmem>>, vector<1x128xf32>
    %154 = arith.addf %148, %153 : vector<1x128xf32>
    %c8_i32_51 = arith.constant 8 : i32
    %c2 = arith.constant 2 : index
    %c0_52 = arith.constant 0 : index
    %155 = vector.load %arg6[%c2, %c0_52] : memref<8x128xf32, #tpu.memory_space<vmem>>, vector<1x128xf32>
    tpu.vector_store %arg6[%c2, %c0_52], %154 {strides = array<i32>} : memref<8x128xf32, #tpu.memory_space<vmem>>, vector<1x128xf32>,
    %c8_i32_53 = arith.constant 8 : i32
    %156 = arith.muli %arg0, %c8_i32_53 : i32
    %c3_i32_54 = arith.constant 3 : i32
    %157 = arith.addi %156, %c3_i32_54 : i32
    %cst_55 = arith.constant 0.000000e+00 : f32
    %158 = vector.broadcast %cst_55 : f32 to vector<1x128xf32>
    %c0_i32_56 = arith.constant 0 : i32
    %159 = arith.index_cast %157 : i32 to index
    %160 = arith.index_cast %c0_i32_56 : i32 to index
    %161 = memref.load %arg1[%159, %160] : memref<8x8xi32, #tpu.memory_space<smem>>
    %162 = arith.index_cast %161 : i32 to index
    %c0_57 = arith.constant 0 : index
    %163 = vector.load %arg2[%162, %c0_57] : memref<32x128xf32, #tpu.memory_space<vmem>>, vector<1x128xf32>
    %164 = arith.addf %158, %163 : vector<1x128xf32>
    %c1_i32_58 = arith.constant 1 : i32
    %165 = arith.index_cast %157 : i32 to index
    %166 = arith.index_cast %c1_i32_58 : i32 to index
    %167 = memref.load %arg1[%165, %166] : memref<8x8xi32, #tpu.memory_space<smem>>
    %168 = arith.index_cast %167 : i32 to index
    %c0_59 = arith.constant 0 : index
    %169 = vector.load %arg2[%168, %c0_59] : memref<32x128xf32, #tpu.memory_space<vmem>>, vector<1x128xf32>
    %170 = arith.addf %164, %169 : vector<1x128xf32>
    %c2_i32_60 = arith.constant 2 : i32
    %171 = arith.index_cast %157 : i32 to index
    %172 = arith.index_cast %c2_i32_60 : i32 to index
    %173 = memref.load %arg1[%171, %172] : memref<8x8xi32, #tpu.memory_space<smem>>
    %174 = arith.index_cast %173 : i32 to index
    %c0_61 = arith.constant 0 : index
    %175 = vector.load %arg2[%174, %c0_61] : memref<32x128xf32, #tpu.memory_space<vmem>>, vector<1x128xf32>
    %176 = arith.addf %170, %175 : vector<1x128xf32>
    %c3_i32_62 = arith.constant 3 : i32
    %177 = arith.index_cast %157 : i32 to index
    %178 = arith.index_cast %c3_i32_62 : i32 to index
    %179 = memref.load %arg1[%177, %178] : memref<8x8xi32, #tpu.memory_space<smem>>
    %180 = arith.index_cast %179 : i32 to index
    %c0_63 = arith.constant 0 : index
    %181 = vector.load %arg2[%180, %c0_63] : memref<32x128xf32, #tpu.memory_space<vmem>>, vector<1x128xf32>
    %182 = arith.addf %176, %181 : vector<1x128xf32>
    %c4_i32_64 = arith.constant 4 : i32
    %183 = arith.index_cast %157 : i32 to index
    %184 = arith.index_cast %c4_i32_64 : i32 to index
    %185 = memref.load %arg1[%183, %184] : memref<8x8xi32, #tpu.memory_space<smem>>
    %186 = arith.index_cast %185 : i32 to index
    %c0_65 = arith.constant 0 : index
    %187 = vector.load %arg2[%186, %c0_65] : memref<32x128xf32, #tpu.memory_space<vmem>>, vector<1x128xf32>
    %188 = arith.addf %182, %187 : vector<1x128xf32>
    %c5_i32_66 = arith.constant 5 : i32
    %189 = arith.index_cast %157 : i32 to index
    %190 = arith.index_cast %c5_i32_66 : i32 to index
    %191 = memref.load %arg1[%189, %190] : memref<8x8xi32, #tpu.memory_space<smem>>
    %192 = arith.index_cast %191 : i32 to index
    %c0_67 = arith.constant 0 : index
    %193 = vector.load %arg2[%192, %c0_67] : memref<32x128xf32, #tpu.memory_space<vmem>>, vector<1x128xf32>
    %194 = arith.addf %188, %193 : vector<1x128xf32>
    %c6_i32_68 = arith.constant 6 : i32
    %195 = arith.index_cast %157 : i32 to index
    %196 = arith.index_cast %c6_i32_68 : i32 to index
    %197 = memref.load %arg1[%195, %196] : memref<8x8xi32, #tpu.memory_space<smem>>
    %198 = arith.index_cast %197 : i32 to index
    %c0_69 = arith.constant 0 : index
    %199 = vector.load %arg2[%198, %c0_69] : memref<32x128xf32, #tpu.memory_space<vmem>>, vector<1x128xf32>
    %200 = arith.addf %194, %199 : vector<1x128xf32>
    %c7_i32_70 = arith.constant 7 : i32
    %201 = arith.index_cast %157 : i32 to index
    %202 = arith.index_cast %c7_i32_70 : i32 to index
    %203 = memref.load %arg1[%201, %202] : memref<8x8xi32, #tpu.memory_space<smem>>
    %204 = arith.index_cast %203 : i32 to index
    %c0_71 = arith.constant 0 : index
    %205 = vector.load %arg2[%204, %c0_71] : memref<32x128xf32, #tpu.memory_space<vmem>>, vector<1x128xf32>
    %206 = arith.addf %200, %205 : vector<1x128xf32>
    %c8_i32_72 = arith.constant 8 : i32
    %c3 = arith.constant 3 : index
    %c0_73 = arith.constant 0 : index
    %207 = vector.load %arg6[%c3, %c0_73] : memref<8x128xf32, #tpu.memory_space<vmem>>, vector<1x128xf32>
    tpu.vector_store %arg6[%c3, %c0_73], %206 {strides = array<i32>} : memref<8x128xf32, #tpu.memory_space<vmem>>, vector<1x128xf32>,
    %c8_i32_74 = arith.constant 8 : i32
    %208 = arith.muli %arg0, %c8_i32_74 : i32
    %c4_i32_75 = arith.constant 4 : i32
    %209 = arith.addi %208, %c4_i32_75 : i32
    %cst_76 = arith.constant 0.000000e+00 : f32
    %210 = vector.broadcast %cst_76 : f32 to vector<1x128xf32>
    %c0_i32_77 = arith.constant 0 : i32
    %211 = arith.index_cast %209 : i32 to index
    %212 = arith.index_cast %c0_i32_77 : i32 to index
    %213 = memref.load %arg1[%211, %212] : memref<8x8xi32, #tpu.memory_space<smem>>
    %214 = arith.index_cast %213 : i32 to index
    %c0_78 = arith.constant 0 : index
    %215 = vector.load %arg2[%214, %c0_78] : memref<32x128xf32, #tpu.memory_space<vmem>>, vector<1x128xf32>
    %216 = arith.addf %210, %215 : vector<1x128xf32>
    %c1_i32_79 = arith.constant 1 : i32
    %217 = arith.index_cast %209 : i32 to index
    %218 = arith.index_cast %c1_i32_79 : i32 to index
    %219 = memref.load %arg1[%217, %218] : memref<8x8xi32, #tpu.memory_space<smem>>
    %220 = arith.index_cast %219 : i32 to index
    %c0_80 = arith.constant 0 : index
    %221 = vector.load %arg2[%220, %c0_80] : memref<32x128xf32, #tpu.memory_space<vmem>>, vector<1x128xf32>
    %222 = arith.addf %216, %221 : vector<1x128xf32>
    %c2_i32_81 = arith.constant 2 : i32
    %223 = arith.index_cast %209 : i32 to index
    %224 = arith.index_cast %c2_i32_81 : i32 to index
    %225 = memref.load %arg1[%223, %224] : memref<8x8xi32, #tpu.memory_space<smem>>
    %226 = arith.index_cast %225 : i32 to index
    %c0_82 = arith.constant 0 : index
    %227 = vector.load %arg2[%226, %c0_82] : memref<32x128xf32, #tpu.memory_space<vmem>>, vector<1x128xf32>
    %228 = arith.addf %222, %227 : vector<1x128xf32>
    %c3_i32_83 = arith.constant 3 : i32
    %229 = arith.index_cast %209 : i32 to index
    %230 = arith.index_cast %c3_i32_83 : i32 to index
    %231 = memref.load %arg1[%229, %230] : memref<8x8xi32, #tpu.memory_space<smem>>
    %232 = arith.index_cast %231 : i32 to index
    %c0_84 = arith.constant 0 : index
    %233 = vector.load %arg2[%232, %c0_84] : memref<32x128xf32, #tpu.memory_space<vmem>>, vector<1x128xf32>
    %234 = arith.addf %228, %233 : vector<1x128xf32>
    %c4_i32_85 = arith.constant 4 : i32
    %235 = arith.index_cast %209 : i32 to index
    %236 = arith.index_cast %c4_i32_85 : i32 to index
    %237 = memref.load %arg1[%235, %236] : memref<8x8xi32, #tpu.memory_space<smem>>
    %238 = arith.index_cast %237 : i32 to index
    %c0_86 = arith.constant 0 : index
    %239 = vector.load %arg2[%238, %c0_86] : memref<32x128xf32, #tpu.memory_space<vmem>>, vector<1x128xf32>
    %240 = arith.addf %234, %239 : vector<1x128xf32>
    %c5_i32_87 = arith.constant 5 : i32
    %241 = arith.index_cast %209 : i32 to index
    %242 = arith.index_cast %c5_i32_87 : i32 to index
    %243 = memref.load %arg1[%241, %242] : memref<8x8xi32, #tpu.memory_space<smem>>
    %244 = arith.index_cast %243 : i32 to index
    %c0_88 = arith.constant 0 : index
    %245 = vector.load %arg2[%244, %c0_88] : memref<32x128xf32, #tpu.memory_space<vmem>>, vector<1x128xf32>
    %246 = arith.addf %240, %245 : vector<1x128xf32>
    %c6_i32_89 = arith.constant 6 : i32
    %247 = arith.index_cast %209 : i32 to index
    %248 = arith.index_cast %c6_i32_89 : i32 to index
    %249 = memref.load %arg1[%247, %248] : memref<8x8xi32, #tpu.memory_space<smem>>
    %250 = arith.index_cast %249 : i32 to index
    %c0_90 = arith.constant 0 : index
    %251 = vector.load %arg2[%250, %c0_90] : memref<32x128xf32, #tpu.memory_space<vmem>>, vector<1x128xf32>
    %252 = arith.addf %246, %251 : vector<1x128xf32>
    %c7_i32_91 = arith.constant 7 : i32
    %253 = arith.index_cast %209 : i32 to index
    %254 = arith.index_cast %c7_i32_91 : i32 to index
    %255 = memref.load %arg1[%253, %254] : memref<8x8xi32, #tpu.memory_space<smem>>
    %256 = arith.index_cast %255 : i32 to index
    %c0_92 = arith.constant 0 : index
    %257 = vector.load %arg2[%256, %c0_92] : memref<32x128xf32, #tpu.memory_space<vmem>>, vector<1x128xf32>
    %258 = arith.addf %252, %257 : vector<1x128xf32>
    %c8_i32_93 = arith.constant 8 : i32
    %c4 = arith.constant 4 : index
    %c0_94 = arith.constant 0 : index
    %259 = vector.load %arg6[%c4, %c0_94] : memref<8x128xf32, #tpu.memory_space<vmem>>, vector<1x128xf32>
    tpu.vector_store %arg6[%c4, %c0_94], %258 {strides = array<i32>} : memref<8x128xf32, #tpu.memory_space<vmem>>, vector<1x128xf32>,
    %c8_i32_95 = arith.constant 8 : i32
    %260 = arith.muli %arg0, %c8_i32_95 : i32
    %c5_i32_96 = arith.constant 5 : i32
    %261 = arith.addi %260, %c5_i32_96 : i32
    %cst_97 = arith.constant 0.000000e+00 : f32
    %262 = vector.broadcast %cst_97 : f32 to vector<1x128xf32>
    %c0_i32_98 = arith.constant 0 : i32
    %263 = arith.index_cast %261 : i32 to index
    %264 = arith.index_cast %c0_i32_98 : i32 to index
    %265 = memref.load %arg1[%263, %264] : memref<8x8xi32, #tpu.memory_space<smem>>
    %266 = arith.index_cast %265 : i32 to index
    %c0_99 = arith.constant 0 : index
    %267 = vector.load %arg2[%266, %c0_99] : memref<32x128xf32, #tpu.memory_space<vmem>>, vector<1x128xf32>
    %268 = arith.addf %262, %267 : vector<1x128xf32>
    %c1_i32_100 = arith.constant 1 : i32
    %269 = arith.index_cast %261 : i32 to index
    %270 = arith.index_cast %c1_i32_100 : i32 to index
    %271 = memref.load %arg1[%269, %270] : memref<8x8xi32, #tpu.memory_space<smem>>
    %272 = arith.index_cast %271 : i32 to index
    %c0_101 = arith.constant 0 : index
    %273 = vector.load %arg2[%272, %c0_101] : memref<32x128xf32, #tpu.memory_space<vmem>>, vector<1x128xf32>
    %274 = arith.addf %268, %273 : vector<1x128xf32>
    %c2_i32_102 = arith.constant 2 : i32
    %275 = arith.index_cast %261 : i32 to index
    %276 = arith.index_cast %c2_i32_102 : i32 to index
    %277 = memref.load %arg1[%275, %276] : memref<8x8xi32, #tpu.memory_space<smem>>
    %278 = arith.index_cast %277 : i32 to index
    %c0_103 = arith.constant 0 : index
    %279 = vector.load %arg2[%278, %c0_103] : memref<32x128xf32, #tpu.memory_space<vmem>>, vector<1x128xf32>
    %280 = arith.addf %274, %279 : vector<1x128xf32>
    %c3_i32_104 = arith.constant 3 : i32
    %281 = arith.index_cast %261 : i32 to index
    %282 = arith.index_cast %c3_i32_104 : i32 to index
    %283 = memref.load %arg1[%281, %282] : memref<8x8xi32, #tpu.memory_space<smem>>
    %284 = arith.index_cast %283 : i32 to index
    %c0_105 = arith.constant 0 : index
    %285 = vector.load %arg2[%284, %c0_105] : memref<32x128xf32, #tpu.memory_space<vmem>>, vector<1x128xf32>
    %286 = arith.addf %280, %285 : vector<1x128xf32>
    %c4_i32_106 = arith.constant 4 : i32
    %287 = arith.index_cast %261 : i32 to index
    %288 = arith.index_cast %c4_i32_106 : i32 to index
    %289 = memref.load %arg1[%287, %288] : memref<8x8xi32, #tpu.memory_space<smem>>
    %290 = arith.index_cast %289 : i32 to index
    %c0_107 = arith.constant 0 : index
    %291 = vector.load %arg2[%290, %c0_107] : memref<32x128xf32, #tpu.memory_space<vmem>>, vector<1x128xf32>
    %292 = arith.addf %286, %291 : vector<1x128xf32>
    %c5_i32_108 = arith.constant 5 : i32
    %293 = arith.index_cast %261 : i32 to index
    %294 = arith.index_cast %c5_i32_108 : i32 to index
    %295 = memref.load %arg1[%293, %294] : memref<8x8xi32, #tpu.memory_space<smem>>
    %296 = arith.index_cast %295 : i32 to index
    %c0_109 = arith.constant 0 : index
    %297 = vector.load %arg2[%296, %c0_109] : memref<32x128xf32, #tpu.memory_space<vmem>>, vector<1x128xf32>
    %298 = arith.addf %292, %297 : vector<1x128xf32>
    %c6_i32_110 = arith.constant 6 : i32
    %299 = arith.index_cast %261 : i32 to index
    %300 = arith.index_cast %c6_i32_110 : i32 to index
    %301 = memref.load %arg1[%299, %300] : memref<8x8xi32, #tpu.memory_space<smem>>
    %302 = arith.index_cast %301 : i32 to index
    %c0_111 = arith.constant 0 : index
    %303 = vector.load %arg2[%302, %c0_111] : memref<32x128xf32, #tpu.memory_space<vmem>>, vector<1x128xf32>
    %304 = arith.addf %298, %303 : vector<1x128xf32>
    %c7_i32_112 = arith.constant 7 : i32
    %305 = arith.index_cast %261 : i32 to index
    %306 = arith.index_cast %c7_i32_112 : i32 to index
    %307 = memref.load %arg1[%305, %306] : memref<8x8xi32, #tpu.memory_space<smem>>
    %308 = arith.index_cast %307 : i32 to index
    %c0_113 = arith.constant 0 : index
    %309 = vector.load %arg2[%308, %c0_113] : memref<32x128xf32, #tpu.memory_space<vmem>>, vector<1x128xf32>
    %310 = arith.addf %304, %309 : vector<1x128xf32>
    %c8_i32_114 = arith.constant 8 : i32
    %c5 = arith.constant 5 : index
    %c0_115 = arith.constant 0 : index
    %311 = vector.load %arg6[%c5, %c0_115] : memref<8x128xf32, #tpu.memory_space<vmem>>, vector<1x128xf32>
    tpu.vector_store %arg6[%c5, %c0_115], %310 {strides = array<i32>} : memref<8x128xf32, #tpu.memory_space<vmem>>, vector<1x128xf32>,
    %c8_i32_116 = arith.constant 8 : i32
    %312 = arith.muli %arg0, %c8_i32_116 : i32
    %c6_i32_117 = arith.constant 6 : i32
    %313 = arith.addi %312, %c6_i32_117 : i32
    %cst_118 = arith.constant 0.000000e+00 : f32
    %314 = vector.broadcast %cst_118 : f32 to vector<1x128xf32>
    %c0_i32_119 = arith.constant 0 : i32
    %315 = arith.index_cast %313 : i32 to index
    %316 = arith.index_cast %c0_i32_119 : i32 to index
    %317 = memref.load %arg1[%315, %316] : memref<8x8xi32, #tpu.memory_space<smem>>
    %318 = arith.index_cast %317 : i32 to index
    %c0_120 = arith.constant 0 : index
    %319 = vector.load %arg2[%318, %c0_120] : memref<32x128xf32, #tpu.memory_space<vmem>>, vector<1x128xf32>
    %320 = arith.addf %314, %319 : vector<1x128xf32>
    %c1_i32_121 = arith.constant 1 : i32
    %321 = arith.index_cast %313 : i32 to index
    %322 = arith.index_cast %c1_i32_121 : i32 to index
    %323 = memref.load %arg1[%321, %322] : memref<8x8xi32, #tpu.memory_space<smem>>
    %324 = arith.index_cast %323 : i32 to index
    %c0_122 = arith.constant 0 : index
    %325 = vector.load %arg2[%324, %c0_122] : memref<32x128xf32, #tpu.memory_space<vmem>>, vector<1x128xf32>
    %326 = arith.addf %320, %325 : vector<1x128xf32>
    %c2_i32_123 = arith.constant 2 : i32
    %327 = arith.index_cast %313 : i32 to index
    %328 = arith.index_cast %c2_i32_123 : i32 to index
    %329 = memref.load %arg1[%327, %328] : memref<8x8xi32, #tpu.memory_space<smem>>
    %330 = arith.index_cast %329 : i32 to index
    %c0_124 = arith.constant 0 : index
    %331 = vector.load %arg2[%330, %c0_124] : memref<32x128xf32, #tpu.memory_space<vmem>>, vector<1x128xf32>
    %332 = arith.addf %326, %331 : vector<1x128xf32>
    %c3_i32_125 = arith.constant 3 : i32
    %333 = arith.index_cast %313 : i32 to index
    %334 = arith.index_cast %c3_i32_125 : i32 to index
    %335 = memref.load %arg1[%333, %334] : memref<8x8xi32, #tpu.memory_space<smem>>
    %336 = arith.index_cast %335 : i32 to index
    %c0_126 = arith.constant 0 : index
    %337 = vector.load %arg2[%336, %c0_126] : memref<32x128xf32, #tpu.memory_space<vmem>>, vector<1x128xf32>
    %338 = arith.addf %332, %337 : vector<1x128xf32>
    %c4_i32_127 = arith.constant 4 : i32
    %339 = arith.index_cast %313 : i32 to index
    %340 = arith.index_cast %c4_i32_127 : i32 to index
    %341 = memref.load %arg1[%339, %340] : memref<8x8xi32, #tpu.memory_space<smem>>
    %342 = arith.index_cast %341 : i32 to index
    %c0_128 = arith.constant 0 : index
    %343 = vector.load %arg2[%342, %c0_128] : memref<32x128xf32, #tpu.memory_space<vmem>>, vector<1x128xf32>
    %344 = arith.addf %338, %343 : vector<1x128xf32>
    %c5_i32_129 = arith.constant 5 : i32
    %345 = arith.index_cast %313 : i32 to index
    %346 = arith.index_cast %c5_i32_129 : i32 to index
    %347 = memref.load %arg1[%345, %346] : memref<8x8xi32, #tpu.memory_space<smem>>
    %348 = arith.index_cast %347 : i32 to index
    %c0_130 = arith.constant 0 : index
    %349 = vector.load %arg2[%348, %c0_130] : memref<32x128xf32, #tpu.memory_space<vmem>>, vector<1x128xf32>
    %350 = arith.addf %344, %349 : vector<1x128xf32>
    %c6_i32_131 = arith.constant 6 : i32
    %351 = arith.index_cast %313 : i32 to index
    %352 = arith.index_cast %c6_i32_131 : i32 to index
    %353 = memref.load %arg1[%351, %352] : memref<8x8xi32, #tpu.memory_space<smem>>
    %354 = arith.index_cast %353 : i32 to index
    %c0_132 = arith.constant 0 : index
    %355 = vector.load %arg2[%354, %c0_132] : memref<32x128xf32, #tpu.memory_space<vmem>>, vector<1x128xf32>
    %356 = arith.addf %350, %355 : vector<1x128xf32>
    %c7_i32_133 = arith.constant 7 : i32
    %357 = arith.index_cast %313 : i32 to index
    %358 = arith.index_cast %c7_i32_133 : i32 to index
    %359 = memref.load %arg1[%357, %358] : memref<8x8xi32, #tpu.memory_space<smem>>
    %360 = arith.index_cast %359 : i32 to index
    %c0_134 = arith.constant 0 : index
    %361 = vector.load %arg2[%360, %c0_134] : memref<32x128xf32, #tpu.memory_space<vmem>>, vector<1x128xf32>
    %362 = arith.addf %356, %361 : vector<1x128xf32>
    %c8_i32_135 = arith.constant 8 : i32
    %c6 = arith.constant 6 : index
    %c0_136 = arith.constant 0 : index
    %363 = vector.load %arg6[%c6, %c0_136] : memref<8x128xf32, #tpu.memory_space<vmem>>, vector<1x128xf32>
    tpu.vector_store %arg6[%c6, %c0_136], %362 {strides = array<i32>} : memref<8x128xf32, #tpu.memory_space<vmem>>, vector<1x128xf32>,
    %c8_i32_137 = arith.constant 8 : i32
    %364 = arith.muli %arg0, %c8_i32_137 : i32
    %c7_i32_138 = arith.constant 7 : i32
    %365 = arith.addi %364, %c7_i32_138 : i32
    %cst_139 = arith.constant 0.000000e+00 : f32
    %366 = vector.broadcast %cst_139 : f32 to vector<1x128xf32>
    %c0_i32_140 = arith.constant 0 : i32
    %367 = arith.index_cast %365 : i32 to index
    %368 = arith.index_cast %c0_i32_140 : i32 to index
    %369 = memref.load %arg1[%367, %368] : memref<8x8xi32, #tpu.memory_space<smem>>
    %370 = arith.index_cast %369 : i32 to index
    %c0_141 = arith.constant 0 : index
    %371 = vector.load %arg2[%370, %c0_141] : memref<32x128xf32, #tpu.memory_space<vmem>>, vector<1x128xf32>
    %372 = arith.addf %366, %371 : vector<1x128xf32>
    %c1_i32_142 = arith.constant 1 : i32
    %373 = arith.index_cast %365 : i32 to index
    %374 = arith.index_cast %c1_i32_142 : i32 to index
    %375 = memref.load %arg1[%373, %374] : memref<8x8xi32, #tpu.memory_space<smem>>
    %376 = arith.index_cast %375 : i32 to index
    %c0_143 = arith.constant 0 : index
    %377 = vector.load %arg2[%376, %c0_143] : memref<32x128xf32, #tpu.memory_space<vmem>>, vector<1x128xf32>
    %378 = arith.addf %372, %377 : vector<1x128xf32>
    %c2_i32_144 = arith.constant 2 : i32
    %379 = arith.index_cast %365 : i32 to index
    %380 = arith.index_cast %c2_i32_144 : i32 to index
    %381 = memref.load %arg1[%379, %380] : memref<8x8xi32, #tpu.memory_space<smem>>
    %382 = arith.index_cast %381 : i32 to index
    %c0_145 = arith.constant 0 : index
    %383 = vector.load %arg2[%382, %c0_145] : memref<32x128xf32, #tpu.memory_space<vmem>>, vector<1x128xf32>
    %384 = arith.addf %378, %383 : vector<1x128xf32>
    %c3_i32_146 = arith.constant 3 : i32
    %385 = arith.index_cast %365 : i32 to index
    %386 = arith.index_cast %c3_i32_146 : i32 to index
    %387 = memref.load %arg1[%385, %386] : memref<8x8xi32, #tpu.memory_space<smem>>
    %388 = arith.index_cast %387 : i32 to index
    %c0_147 = arith.constant 0 : index
    %389 = vector.load %arg2[%388, %c0_147] : memref<32x128xf32, #tpu.memory_space<vmem>>, vector<1x128xf32>
    %390 = arith.addf %384, %389 : vector<1x128xf32>
    %c4_i32_148 = arith.constant 4 : i32
    %391 = arith.index_cast %365 : i32 to index
    %392 = arith.index_cast %c4_i32_148 : i32 to index
    %393 = memref.load %arg1[%391, %392] : memref<8x8xi32, #tpu.memory_space<smem>>
    %394 = arith.index_cast %393 : i32 to index
    %c0_149 = arith.constant 0 : index
    %395 = vector.load %arg2[%394, %c0_149] : memref<32x128xf32, #tpu.memory_space<vmem>>, vector<1x128xf32>
    %396 = arith.addf %390, %395 : vector<1x128xf32>
    %c5_i32_150 = arith.constant 5 : i32
    %397 = arith.index_cast %365 : i32 to index
    %398 = arith.index_cast %c5_i32_150 : i32 to index
    %399 = memref.load %arg1[%397, %398] : memref<8x8xi32, #tpu.memory_space<smem>>
    %400 = arith.index_cast %399 : i32 to index
    %c0_151 = arith.constant 0 : index
    %401 = vector.load %arg2[%400, %c0_151] : memref<32x128xf32, #tpu.memory_space<vmem>>, vector<1x128xf32>
    %402 = arith.addf %396, %401 : vector<1x128xf32>
    %c6_i32_152 = arith.constant 6 : i32
    %403 = arith.index_cast %365 : i32 to index
    %404 = arith.index_cast %c6_i32_152 : i32 to index
    %405 = memref.load %arg1[%403, %404] : memref<8x8xi32, #tpu.memory_space<smem>>
    %406 = arith.index_cast %405 : i32 to index
    %c0_153 = arith.constant 0 : index
    %407 = vector.load %arg2[%406, %c0_153] : memref<32x128xf32, #tpu.memory_space<vmem>>, vector<1x128xf32>
    %408 = arith.addf %402, %407 : vector<1x128xf32>
    %c7_i32_154 = arith.constant 7 : i32
    %409 = arith.index_cast %365 : i32 to index
    %410 = arith.index_cast %c7_i32_154 : i32 to index
    %411 = memref.load %arg1[%409, %410] : memref<8x8xi32, #tpu.memory_space<smem>>
    %412 = arith.index_cast %411 : i32 to index
    %c0_155 = arith.constant 0 : index
    %413 = vector.load %arg2[%412, %c0_155] : memref<32x128xf32, #tpu.memory_space<vmem>>, vector<1x128xf32>
    %414 = arith.addf %408, %413 : vector<1x128xf32>
    %c8_i32_156 = arith.constant 8 : i32
    %c7 = arith.constant 7 : index
    %c0_157 = arith.constant 0 : index
    %415 = vector.load %arg6[%c7, %c0_157] : memref<8x128xf32, #tpu.memory_space<vmem>>, vector<1x128xf32>
    tpu.vector_store %arg6[%c7, %c0_157], %414 {strides = array<i32>} : memref<8x128xf32, #tpu.memory_space<vmem>>, vector<1x128xf32>,
    %c0_158 = arith.constant 0 : index
    %c0_159 = arith.constant 0 : index
    %416 = vector.load %arg6[%c0_158, %c0_159] : memref<8x128xf32, #tpu.memory_space<vmem>>, vector<8x128xf32>
    %c0_160 = arith.constant 0 : index
    %c0_161 = arith.constant 0 : index
    %417 = vector.load %arg3[%c0_160, %c0_161] : memref<128x128xf32, #tpu.memory_space<vmem>>, vector<128x128xf32>
    %cst_162 = arith.constant dense<0.000000e+00> : vector<8x128xf32>
    %418 = tpu.matmul %416, %417, %cst_162 {dimension_numbers = #tpu.dot_dimension_numbers<[1], [1], [0], [0], [0, 0, 1, 0], [], []>} : vector<8x128xf32>, vector<128x128xf32>, vector<8x128xf32> -> vector<8x128xf32>
    %c0_163 = arith.constant 0 : index
    %c0_164 = arith.constant 0 : index
    %419 = vector.load %arg4[%c0_163, %c0_164] : memref<1x128xf32, #tpu.memory_space<vmem>>, vector<1x128xf32>
    %420 = vector.broadcast %419 : vector<1x128xf32> to vector<8x128xf32>
    %421 = arith.addf %418, %420 : vector<8x128xf32>
    %422 = tpu.iota {dimensions = array<i32: 1>} : vector<8x128xi32>
    %c8_i32_165 = arith.constant 8 : i32
    %423 = vector.broadcast %c8_i32_165 : i32 to vector<8x128xi32>
    %424 = arith.cmpi slt, %422, %423 : vector<8x128xi32>
    %cst_166 = arith.constant -1.000000e+30 : f32
    %425 = vector.broadcast %cst_166 : f32 to vector<8x128xf32>
    %426 = arith.select %424, %421, %425 : vector<8x128xi1>, vector<8x128xf32>
    %cst_167 = arith.constant dense<0xFF800000> : vector<8xf32>
    %427 = vector.multi_reduction <maximumf>, %426, %cst_167 [1] : vector<8x128xf32> to vector<8xf32>
    %428 = vector.shape_cast %427 : vector<8xf32> to vector<8x1xf32>
    %429 = vector.broadcast %428 : vector<8x1xf32> to vector<8x128xf32>
    %430 = arith.subf %426, %429 : vector<8x128xf32>
    %431 = math.exp %430 : vector<8x128xf32>
    %cst_168 = arith.constant dense<0.000000e+00> : vector<8xf32>
    %432 = vector.multi_reduction <add>, %431, %cst_168 [1] : vector<8x128xf32> to vector<8xf32>
    %433 = vector.shape_cast %432 : vector<8xf32> to vector<8x1xf32>
    %434 = math.log %433 : vector<8x1xf32>
    %435 = vector.broadcast %434 : vector<8x1xf32> to vector<8x128xf32>
    %436 = arith.subf %430, %435 : vector<8x128xf32>
    %c0_169 = arith.constant 0 : index
    %c0_170 = arith.constant 0 : index
    %437 = vector.load %arg5[%c0_169, %c0_170] : memref<8x128xf32, #tpu.memory_space<vmem>>, vector<8x128xf32>
    tpu.vector_store %arg5[%c0_169, %c0_170], %436 {strides = array<i32>} : memref<8x128xf32, #tpu.memory_space<vmem>>, vector<8x128xf32>,
    return
  }
  func.func @transform_0(%arg0: i32, %arg1: memref<8x8xi32, #tpu.memory_space<smem>>) -> (i32, i32) {
    %c0_i32 = arith.constant 0 : i32
    %c0_i32_0 = arith.constant 0 : i32
    %c0_i32_1 = arith.constant 0 : i32
    return %c0_i32, %c0_i32_0 : i32, i32
  }
  func.func @transform_1(%arg0: i32, %arg1: memref<8x8xi32, #tpu.memory_space<smem>>) -> (i32, i32) {
    %c0_i32 = arith.constant 0 : i32
    %c0_i32_0 = arith.constant 0 : i32
    %c0_i32_1 = arith.constant 0 : i32
    return %c0_i32, %c0_i32_0 : i32, i32
  }
  func.func @transform_2(%arg0: i32, %arg1: memref<8x8xi32, #tpu.memory_space<smem>>) -> (i32, i32) {
    %c0_i32 = arith.constant 0 : i32
    %c0_i32_0 = arith.constant 0 : i32
    %c0_i32_1 = arith.constant 0 : i32
    return %c0_i32, %c0_i32_0 : i32, i32
  }
  func.func @transform_3(%arg0: i32, %arg1: memref<8x8xi32, #tpu.memory_space<smem>>) -> (i32, i32) {
    %c0_i32 = arith.constant 0 : i32
    %c0_i32_0 = arith.constant 0 : i32
    return %arg0, %c0_i32 : i32, i32
  }
}

</mosaic_0001>

<bundles_post_ra>
// kernel: tpu_custom_call.1
= control target key start
LH: loop header
LB: loop body
LE: loop exit
PB: predicated region body
PF: predicated region fallthrough
CT: control target
= control target key end

     0   :  { %s696_s18 = smov [#allocation4]   ;;  %s844_s0 = inlined_call_operand.hbm [shape: s32[8,8], index: 0, kind: input, shape index: {}]   ;;  %s845_s1 = inlined_call_operand.hbm [shape: f32[32,128], index: 1, kind: input, shape index: {}]   ;;  %s846_s2 = inlined_call_operand.hbm [shape: f32[128,128], index: 2, kind: input, shape index: {}]   ;;  %s847_s3 = inlined_call_operand.vmem [shape: f32[1,128], index: 3, kind: input, shape index: {}]   ;;  %s848_s4 = inlined_call_operand.hbm [shape: f32[8,128], index: 4, kind: output, shape index: {}]  }
   0x1   :  { %s10_s17 = sshll.u32 %s844_s0, 4  ;;  %s11_s17 = int_to_ptr.hbm [resolvable:$true] %s10_s17 }
   0x2   :  { %13 = dma.hbm_to_smem %s11_s17, 128, %s696_s18, [#allocation3] }
   0x3   :  { %688 = dma.done.wait [#allocation3], 128 }
   0x4   :  { %689 = vsyncadd [#allocation3], 4294967168 }
   0x5   :  { %16 = sfence }
   0x6   :  { %17 = vsyncpa [#allocation6], 0 }
   0x7   :  { %18 = vsyncpa [#allocation9], 0 }
   0x8   :  { %19 = vsyncpa [#allocation7], 0  ;;  %s24_s21 = sshll.u32 %s845_s1, 4  ;;  %s697_s22 = smov [#allocation5]   ;;  %s25_s21 = int_to_ptr.hbm [resolvable:$true] %s24_s21 }
   0x9   :  { %s26_s23 = sshll.u32 %s697_s22, 4  ;;  %s37_s0 = sshll.u32 %s846_s2, 4  ;;  %s27_s23 = int_to_ptr.vmem [resolvable:$true] %s26_s23  ;;  %s38_s0 = int_to_ptr.hbm [resolvable:$true] %s37_s0 }
   0xa   :  { %s698_s26 = smov 128   ;;  %s699_s27 = smov 8  }
   0xb   :  { %32 = dma.hbm_to_vmem [thread:$0]  %s25_s21, 512, %s27_s23, [#allocation6], %s698_s26, %s698_s26, %s699_s27  }
   0xc   :  { %s700_s28 = smov [#allocation8]  }
   0xd   :  { %s39_s29 = sshll.u32 %s700_s28, 4  ;;  %s40_s29 = int_to_ptr.vmem [resolvable:$true] %s39_s29 }
   0xe   :  { %45 = dma.hbm_to_vmem [thread:$0]  %s38_s0, 2048, %s40_s29, [#allocation9], %s698_s26, %s698_s26, %s699_s27  }
   0xf   :  { %690 = dma.done.wait [#allocation6], 512  }
  0x10   :  { %691 = vsyncadd [#allocation6], 4294966784 }
  0x11   :  { %692 = dma.done.wait [#allocation9], 2048  }
  0x12   :  { %693 = vsyncadd [#allocation9], 4294965248  ;;  %s58_s1 = sld [smem:[#allocation4]]  ;;  %v408_v0 = vld [vmem:[#allocation8 + $0x78] sm:$0xff]  ;;  %v407_v1 = vld [vmem:[#allocation8 + $0x70] sm:$0xff] }
  0x13   :  { %s530_s30 = sld [smem:[#allocation4 + $0x1]]  ;;  %413 = vmatpush.xpose.msra.mxu0 %v408_v0  ;;  %v406_v2 = vld [vmem:[#allocation8 + $0x68] sm:$0xff]  ;;  %v405_v3 = vld [vmem:[#allocation8 + $0x60] sm:$0xff]  ;;  %v404_v16 = vld [vmem:[#allocation8 + $0x58] sm:$0xff] }
  0x14   :  { %s736_s5 = sld [smem:[#allocation4 + $0x2]]  ;;  %v403_v25 = vld [vmem:[#allocation8 + $0x50] sm:$0xff]  ;;  %v402_v34 = vld [vmem:[#allocation8 + $0x48] sm:$0xff]  ;;  %v401_v43 = vld [vmem:[#allocation8 + $0x40] sm:$0xff] }
  0x15   :  { %s738_s6 = sld [smem:[#allocation4 + $0x3]]  ;;  %v400_v48 = vld [vmem:[#allocation8 + $0x38] sm:$0xff]  ;;  %v399_v54 = vld [vmem:[#allocation8 + $0x30] sm:$0xff]  ;;  %v398_v61 = vld [vmem:[#allocation8 + $0x28] sm:$0xff] }
  0x16   :  { %s740_s7 = sld [smem:[#allocation4 + $0x4]] }
  0x17   :  { %s742_s2 = sld [smem:[#allocation4 + $0x5]]  ;;  %414 = vmatpush.xpose.msra.mxu0 %v407_v1 }
  0x18   :  { %s744_s8 = sld [smem:[#allocation4 + $0x6]]  ;;  %s59_s17 = scalar_lea.vmem [#allocation5], %s58_s1 }
  0x19   :  { %s746_s9 = sld [smem:[#allocation4 + $0x7]]  ;;  %v60_v4 = vld [vmem:[%s59_s17] sm:$0x1]  ;;  %s64_s18 = scalar_lea.vmem [#allocation5], %s530_s30 }
  0x1a   :  { %s537_s10 = sld [smem:[#allocation4 + $0x80]]  ;;  %v65_v5 = vld [vmem:[%s64_s18] sm:$0x1]  ;;  %s69_s21 = scalar_lea.vmem [#allocation5], %s736_s5 }
  0x1b   :  { %s538_s11 = sld [smem:[#allocation4 + $0x81]]  ;;  %415 = vmatpush.xpose.msra.mxu0 %v406_v2  ;;  %v66_v6 = vadd.f32 %v65_v5, %v60_v4  ;;  %v70_v9 = vld [vmem:[%s69_s21] sm:$0x1]  ;;  %s74_s24 = scalar_lea.vmem [#allocation5], %s738_s6  ;;  %v397_v4 = vld [vmem:[#allocation8 + $0x20] sm:$0xff] }
  0x1c   :  { %s539_s12 = sld [smem:[#allocation4 + $0x82]]  ;;  %v75_v13 = vld [vmem:[%s74_s24] sm:$0x1]  ;;  %s79_s26 = scalar_lea.vmem [#allocation5], %s740_s7 }
  0x1d   :  { %s540_s13 = sld [smem:[#allocation4 + $0x83]]  ;;  %v71_v12 = vadd.f32 %v70_v9, %v66_v6  ;;  %v80_v18 = vld [vmem:[%s79_s26] sm:$0x1]  ;;  %s84_s1 = scalar_lea.vmem [#allocation5], %s742_s2 }
  0x1e   :  { %s748_s14 = sld [smem:[#allocation4 + $0x84]]  ;;  %v85_v22 = vld [vmem:[%s84_s1] sm:$0x1]  ;;  %s89_s6 = scalar_lea.vmem [#allocation5], %s744_s8 }
  0x1f   :  { %s750_s15 = sld [smem:[#allocation4 + $0x85]]  ;;  %416 = vmatpush.xpose.msra.mxu0 %v405_v3  ;;  %v76_v17 = vadd.f32 %v75_v13, %v71_v12  ;;  %v90_v27 = vld [vmem:[%s89_s6] sm:$0x1] }
  0x20   :  { %s752_s16 = sld [smem:[#allocation4 + $0x86]]  ;;  %s101_s19 = scalar_lea.vmem [#allocation5], %s537_s10  ;;  %v396_v13 = vld [vmem:[#allocation8 + $0x18] sm:$0xff] }
  0x21   :  { %v102_v7 = vld [vmem:[%s101_s19] sm:$0x1]  ;;  %s106_s20 = scalar_lea.vmem [#allocation5], %s538_s11  ;;  %s755_s23 = sld [smem:[#allocation4 + $0x87]]  ;;  %v81_v21 = vadd.f32 %v80_v18, %v76_v17 }
  0x22   :  { %v107_v8 = vld [vmem:[%s106_s20] sm:$0x1]  ;;  %s111_s22 = scalar_lea.vmem [#allocation5], %s539_s12  ;;  %s758_s0 = sld [smem:[#allocation4 + $0x100]] }
  0x23   :  { %v108_v10 = vadd.f32 %v107_v8, %v102_v7  ;;  %v112_v11 = vld [vmem:[%s111_s22] sm:$0x1]  ;;  %s116_s25 = scalar_lea.vmem [#allocation5], %s540_s13  ;;  %s762_s28 = sld [smem:[#allocation4 + $0x101]]  ;;  %417 = vmatpush.xpose.msra.mxu0 %v404_v16  ;;  %v86_v26 = vadd.f32 %v85_v22, %v81_v21 }
  0x24   :  { %v117_v15 = vld [vmem:[%s116_s25] sm:$0x1]  ;;  %s121_s27 = scalar_lea.vmem [#allocation5], %s748_s14  ;;  %s764_s29 = sld [smem:[#allocation4 + $0x102]] }
  0x25   :  { %v113_v14 = vadd.f32 %v112_v11, %v108_v10  ;;  %v122_v20 = vld [vmem:[%s121_s27] sm:$0x1]  ;;  %s126_s30 = scalar_lea.vmem [#allocation5], %s750_s15  ;;  %s768_s5 = sld [smem:[#allocation4 + $0x103]]  ;;  %v91_v30 = vadd.f32 %v90_v27, %v86_v26 }
  0x26   :  { %v127_v24 = vld [vmem:[%s126_s30] sm:$0x1]  ;;  %s131_s7 = scalar_lea.vmem [#allocation5], %s752_s16  ;;  %s772_s10 = sld [smem:[#allocation4 + $0x104]] }
  0x27   :  { %v118_v19 = vadd.f32 %v117_v15, %v113_v14  ;;  %v132_v29 = vld [vmem:[%s131_s7] sm:$0x1]  ;;  %s774_s2 = sld [smem:[#allocation4 + $0x105]]  ;;  %418 = vmatpush.xpose.msra.mxu0 %v403_v25  ;;  %s94_s11 = scalar_lea.vmem [#allocation5], %s746_s9 }
  0x28   :  { %v95_v31 = vld [vmem:[%s94_s11] sm:$0x1]  ;;  %s136_s12 = scalar_lea.vmem [#allocation5], %s755_s23  ;;  %s143_s8 = scalar_lea.vmem [#allocation5], %s758_s0 }
  0x29   :  { %v123_v23 = vadd.f32 %v122_v20, %v118_v19  ;;  %v137_v33 = vld [vmem:[%s136_s12] sm:$0x1]  ;;  %v96_v35 = vadd.f32 %v95_v31, %v91_v30  ;;  %s148_s13 = scalar_lea.vmem [#allocation5], %s762_s28  ;;  %s551_s15 = sld [smem:[#allocation4 + $0x106]]  ;;  %v395_v20 = vld [vmem:[#allocation8 + $0x10] sm:$0xff] }
  0x2a   :  { %v144_v36 = vld [vmem:[%s143_s8] sm:$0x1]  ;;  %s153_s14 = scalar_lea.vmem [#allocation5], %s764_s29  ;;  %s552_s9 = sld [smem:[#allocation4 + $0x107]] }
  0x2b   :  { %v128_v28 = vadd.f32 %v127_v24, %v123_v23  ;;  %v149_v37 = vld [vmem:[%s148_s13] sm:$0x1]  ;;  %97 = vst [vmem:[#allocation2] sm:$0x1] %v96_v35  ;;  %419 = vmatpush.xpose.msra.mxu0 %v402_v34  ;;  %s158_s16 = scalar_lea.vmem [#allocation5], %s768_s5  ;;  %s553_s18 = sld [smem:[#allocation4 + $0x180]] }
  0x2c   :  { %v150_v39 = vadd.f32 %v149_v37, %v144_v36  ;;  %v154_v40 = vld [vmem:[%s153_s14] sm:$0x1]  ;;  %s163_s17 = scalar_lea.vmem [#allocation5], %s772_s10  ;;  %s554_s19 = sld [smem:[#allocation4 + $0x181]]  ;;  %v393_v35 = vld [vmem:[#allocation8] sm:$0xff] }
  0x2d   :  { %v133_v32 = vadd.f32 %v132_v29, %v128_v28  ;;  %v159_v42 = vld [vmem:[%s158_s16] sm:$0x1]  ;;  %s168_s20 = scalar_lea.vmem [#allocation5], %s774_s2  ;;  %s555_s21 = sld [smem:[#allocation4 + $0x182]]  ;;  %v394_v29 = vld [vmem:[#allocation8 + $0x8] sm:$0xff] }
  0x2e   :  { %v155_v41 = vadd.f32 %v154_v40, %v150_v39  ;;  %v164_v44 = vld [vmem:[%s163_s17] sm:$0x1]  ;;  %s556_s22 = sld [smem:[#allocation4 + $0x183]] }
  0x2f   :  { %v138_v38 = vadd.f32 %v137_v33, %v133_v32  ;;  %v169_v46 = vld [vmem:[%s168_s20] sm:$0x1]  ;;  %420 = vmatpush.xpose.msra.mxu0 %v401_v43  ;;  %s173_s23 = scalar_lea.vmem [#allocation5], %s551_s15  ;;  %s557_s24 = sld [smem:[#allocation4 + $0x184]] }
  0x30   :  { %v160_v45 = vadd.f32 %v159_v42, %v155_v41  ;;  %v174_v49 = vld [vmem:[%s173_s23] sm:$0x1]  ;;  %s784_s25 = sld [smem:[#allocation4 + $0x185]]  ;;  %s178_s0 = scalar_lea.vmem [#allocation5], %s552_s9 }
  0x31   :  { %139 = vst [vmem:[#allocation2 + $0x1] sm:$0x1] %v138_v38  ;;  %v179_v51 = vld [vmem:[%s178_s0] sm:$0x1]  ;;  %s786_s26 = sld [smem:[#allocation4 + $0x186]]  ;;  %s185_s27 = scalar_lea.vmem [#allocation5], %s553_s18 }
  0x32   :  { %v165_v47 = vadd.f32 %v164_v44, %v160_v45  ;;  %v186_v53 = vld [vmem:[%s185_s27] sm:$0x1]  ;;  %s788_s28 = sld [smem:[#allocation4 + $0x187]]  ;;  %s190_s29 = scalar_lea.vmem [#allocation5], %s554_s19 }
  0x33   :  { %421 = vmatpush.xpose.msra.mxu0 %v400_v48  ;;  %v191_v55 = vld [vmem:[%s190_s29] sm:$0x1]  ;;  %s561_s1 = sld [smem:[#allocation4 + $0x200]]  ;;  %s195_s30 = scalar_lea.vmem [#allocation5], %s555_s21 }
  0x34   :  { %v170_v50 = vadd.f32 %v169_v46, %v165_v47  ;;  %v192_v57 = vadd.f32 %v191_v55, %v186_v53  ;;  %v196_v58 = vld [vmem:[%s195_s30] sm:$0x1]  ;;  %s562_s5 = sld [smem:[#allocation4 + $0x201]]  ;;  %s200_s6 = scalar_lea.vmem [#allocation5], %s556_s22 }
  0x35   :  { %v201_v59 = vld [vmem:[%s200_s6] sm:$0x1]  ;;  %s563_s7 = sld [smem:[#allocation4 + $0x202]]  ;;  %s205_s10 = scalar_lea.vmem [#allocation5], %s557_s24 }
  0x36   :  { %v175_v52 = vadd.f32 %v174_v49, %v170_v50  ;;  %v197_v60 = vadd.f32 %v196_v58, %v192_v57  ;;  %v206_v62 = vld [vmem:[%s205_s10] sm:$0x1]  ;;  %s790_s2 = sld [smem:[#allocation4 + $0x203]]  ;;  %s210_s11 = scalar_lea.vmem [#allocation5], %s784_s25 }
  0x37   :  { %422 = vmatpush.xpose.msra.mxu0 %v399_v54  ;;  %v211_v0 = vld [vmem:[%s210_s11] sm:$0x1]  ;;  %s793_s12 = sld [smem:[#allocation4 + $0x204]]  ;;  %s215_s8 = scalar_lea.vmem [#allocation5], %s786_s26 }
  0x38   :  { %v180_v56 = vadd.f32 %v179_v51, %v175_v52  ;;  %v202_v63 = vadd.f32 %v201_v59, %v197_v60  ;;  %v216_v1 = vld [vmem:[%s215_s8] sm:$0x1]  ;;  %s796_s13 = sld [smem:[#allocation4 + $0x205]]  ;;  %s220_s19 = scalar_lea.vmem [#allocation5], %s788_s28 }
  0x39   :  { %s227_s14 = scalar_lea.vmem [#allocation5], %s561_s1  ;;  %s798_s15 = sld [smem:[#allocation4 + $0x206]]  ;;  %v221_v9 = vld [vmem:[%s220_s19] sm:$0x1] }
  0x3a   :  { %181 = vst [vmem:[#allocation2 + $0x2] sm:$0x1] %v180_v56  ;;  %v207_v2 = vadd.f32 %v206_v62, %v202_v63  ;;  %v228_v3 = vld [vmem:[%s227_s14] sm:$0x1]  ;;  %s232_s9 = scalar_lea.vmem [#allocation5], %s562_s5  ;;  %s800_s16 = sld [smem:[#allocation4 + $0x207]] }
  0x3b   :  { %423 = vmatpush.xpose.msra.mxu0 %v398_v61  ;;  %v233_v5 = vld [vmem:[%s232_s9] sm:$0x1]  ;;  %s237_s17 = scalar_lea.vmem [#allocation5], %s563_s7  ;;  %s802_s18 = sld [smem:[#allocation4 + $0x280]] }
  0x3c   :  { %v212_v6 = vadd.f32 %v211_v0, %v207_v2  ;;  %v234_v7 = vadd.f32 %v233_v5, %v228_v3  ;;  %v238_v8 = vld [vmem:[%s237_s17] sm:$0x1]  ;;  %s805_s20 = sld [smem:[#allocation4 + $0x281]]  ;;  %s242_s21 = scalar_lea.vmem [#allocation5], %s790_s2 }
  0x3d   :  { %v243_v12 = vld [vmem:[%s242_s21] sm:$0x1]  ;;  %s571_s22 = sld [smem:[#allocation4 + $0x282]]  ;;  %s247_s23 = scalar_lea.vmem [#allocation5], %s793_s12 }
  0x3e   :  { %v217_v10 = vadd.f32 %v216_v1, %v212_v6  ;;  %v239_v11 = vadd.f32 %v238_v8, %v234_v7  ;;  %v248_v14 = vld [vmem:[%s247_s23] sm:$0x1]  ;;  %s809_s24 = sld [smem:[#allocation4 + $0x283]]  ;;  %s252_s0 = scalar_lea.vmem [#allocation5], %s796_s13 }
  0x3f   :  { %424 = vmatpush.xpose.msra.mxu0 %v397_v4  ;;  %s811_s25 = sld [smem:[#allocation4 + $0x284]]  ;;  %v253_v17 = vld [vmem:[%s252_s0] sm:$0x1]  ;;  %s257_s27 = scalar_lea.vmem [#allocation5], %s798_s15 }
  0x40   :  { %v222_v15 = vadd.f32 %v221_v9, %v217_v10  ;;  %v244_v16 = vadd.f32 %v243_v12, %v239_v11  ;;  %s814_s26 = sld [smem:[#allocation4 + $0x285]]  ;;  %v258_v19 = vld [vmem:[%s257_s27] sm:$0x1]  ;;  %s262_s28 = scalar_lea.vmem [#allocation5], %s800_s16  ;;  %v433_v9 = vlaneseq }
  0x41   :  { %v263_v21 = vld [vmem:[%s262_s28] sm:$0x1]  ;;  %s269_s29 = scalar_lea.vmem [#allocation5], %s802_s18  ;;  %s819_s1 = sld [smem:[#allocation4 + $0x286]] }
  0x42   :  { %223 = vst [vmem:[#allocation2 + $0x3] sm:$0x1] %v222_v15  ;;  %v249_v18 = vadd.f32 %v248_v14, %v244_v16  ;;  %v270_v22 = vld [vmem:[%s269_s29] sm:$0x1]  ;;  %s274_s30 = scalar_lea.vmem [#allocation5], %s805_s20  ;;  %s822_s5 = sld [smem:[#allocation4 + $0x287]] }
  0x43   :  { %425 = vmatpush.xpose.msra.mxu0 %v396_v13  ;;  %v275_v24 = vld [vmem:[%s274_s30] sm:$0x1]  ;;  %s279_s6 = scalar_lea.vmem [#allocation5], %s571_s22  ;;  %s577_s7 = sld [smem:[#allocation4 + $0x300]]  ;;  %v434_v10 = vand.u32 127, %v433_v9 }
  0x44   :  { %v254_v23 = vadd.f32 %v253_v17, %v249_v18  ;;  %v276_v25 = vadd.f32 %v275_v24, %v270_v22  ;;  %v280_v26 = vld [vmem:[%s279_s6] sm:$0x1]  ;;  %s284_s10 = scalar_lea.vmem [#allocation5], %s809_s24  ;;  %s578_s2 = sld [smem:[#allocation4 + $0x301]] }
  0x45   :  { %v285_v28 = vld [vmem:[%s284_s10] sm:$0x1]  ;;  %s579_s11 = sld [smem:[#allocation4 + $0x302]]  ;;  %s289_s12 = scalar_lea.vmem [#allocation5], %s811_s25  ;;  %vm435_vm0 = vcmp.lt.s32.totalorder %v434_v10, 8 }
  0x46   :  { %v259_v27 = vadd.f32 %v258_v19, %v254_v23  ;;  %v281_v30 = vadd.f32 %v280_v26, %v276_v25  ;;  %v290_v32 = vld [vmem:[%s289_s12] sm:$0x1]  ;;  %s580_s8 = sld [smem:[#allocation4 + $0x303]]  ;;  %s294_s14 = scalar_lea.vmem [#allocation5], %s814_s26 }
  0x47   :  { %426 = vmatpush.xpose.msra.mxu0 %v395_v20  ;;  %s826_s13 = sld [smem:[#allocation4 + $0x304]]  ;;  %v295_v34 = vld [vmem:[%s294_s14] sm:$0x1]  ;;  %s299_s15 = scalar_lea.vmem [#allocation5], %s819_s1 }
  0x48   :  { %v264_v31 = vadd.f32 %v263_v21, %v259_v27  ;;  %v286_v33 = vadd.f32 %v285_v28, %v281_v30  ;;  %v300_v37 = vld [vmem:[%s299_s15] sm:$0x1]  ;;  %s830_s9 = sld [smem:[#allocation4 + $0x305]]  ;;  %s304_s16 = scalar_lea.vmem [#allocation5], %s822_s5 }
  0x49   :  { %v305_v38 = vld [vmem:[%s304_s16] sm:$0x1]  ;;  %s311_s17 = scalar_lea.vmem [#allocation5], %s577_s7  ;;  %s583_s18 = sld [smem:[#allocation4 + $0x306]] }
  0x4a   :  { %265 = vst [vmem:[#allocation2 + $0x4] sm:$0x1] %v264_v31  ;;  %v291_v36 = vadd.f32 %v290_v32, %v286_v33  ;;  %v312_v39 = vld [vmem:[%s311_s17] sm:$0x1]  ;;  %s316_s19 = scalar_lea.vmem [#allocation5], %s578_s2  ;;  %s833_s20 = sld [smem:[#allocation4 + $0x307]] }
  0x4b   :  { %427 = vmatpush.xpose.msra.mxu0 %v394_v29  ;;  %v317_v41 = vld [vmem:[%s316_s19] sm:$0x1]  ;;  %s321_s21 = scalar_lea.vmem [#allocation5], %s579_s11  ;;  %s585_s22 = sld [smem:[#allocation4 + $0x380]] }
  0x4c   :  { %v296_v40 = vadd.f32 %v295_v34, %v291_v36  ;;  %v318_v42 = vadd.f32 %v317_v41, %v312_v39  ;;  %v322_v43 = vld [vmem:[%s321_s21] sm:$0x1]  ;;  %s326_s23 = scalar_lea.vmem [#allocation5], %s580_s8  ;;  %s586_s24 = sld [smem:[#allocation4 + $0x381]] }
  0x4d   :  { %v327_v45 = vld [vmem:[%s326_s23] sm:$0x1]  ;;  %s587_s25 = sld [smem:[#allocation4 + $0x382]]  ;;  %s331_s0 = scalar_lea.vmem [#allocation5], %s826_s13 }
  0x4e   :  { %v301_v44 = vadd.f32 %v300_v37, %v296_v40  ;;  %v323_v46 = vadd.f32 %v322_v43, %v318_v42  ;;  %v332_v48 = vld [vmem:[%s331_s0] sm:$0x1]  ;;  %s588_s26 = sld [smem:[#allocation4 + $0x383]]  ;;  %s336_s28 = scalar_lea.vmem [#allocation5], %s830_s9 }
  0x4f   :  { %428 = vmatpush.xpose.msra.mxu0 %v393_v35  ;;  %s589_s27 = sld [smem:[#allocation4 + $0x384]]  ;;  %v337_v50 = vld [vmem:[%s336_s28] sm:$0x1]  ;;  %s341_s29 = scalar_lea.vmem [#allocation5], %s583_s18 }
  0x50   :  { %v306_v47 = vadd.f32 %v305_v38, %v301_v44  ;;  %v328_v49 = vadd.f32 %v327_v45, %v323_v46  ;;  %v342_v52 = vld [vmem:[%s341_s29] sm:$0x1]  ;;  %s590_s1 = sld [smem:[#allocation4 + $0x385]]  ;;  %s346_s10 = scalar_lea.vmem [#allocation5], %s833_s20 }
  0x51   :  { %s353_s30 = scalar_lea.vmem [#allocation5], %s585_s22  ;;  %s591_s5 = sld [smem:[#allocation4 + $0x386]]  ;;  %v347_v56 = vld [vmem:[%s346_s10] sm:$0x1] }
  0x52   :  { %307 = vst [vmem:[#allocation2 + $0x5] sm:$0x1] %v306_v47  ;;  %v333_v51 = vadd.f32 %v332_v48, %v328_v49  ;;  %v354_v53 = vld [vmem:[%s353_s30] sm:$0x1]  ;;  %s358_s6 = scalar_lea.vmem [#allocation5], %s586_s24  ;;  %s592_s7 = sld [smem:[#allocation4 + $0x387]] }
  0x53   :  { %v359_v55 = vld [vmem:[%s358_s6] sm:$0x1]  ;;  %s363_s2 = scalar_lea.vmem [#allocation5], %s587_s25  ;;  %s701_s16 = smov [#allocation10]  }
  0x54   :  { %v338_v54 = vadd.f32 %v337_v50, %v333_v51  ;;  %v360_v57 = vadd.f32 %v359_v55, %v354_v53  ;;  %v364_v58 = vld [vmem:[%s363_s2] sm:$0x1]  ;;  %s368_s11 = scalar_lea.vmem [#allocation5], %s588_s26  ;;  %s453_s17 = sshll.u32 %s701_s16, 4  ;;  %s454_s17 = int_to_ptr.vmem [resolvable:$true] %s453_s17 }
  0x55   :  { %v369_v60 = vld [vmem:[%s368_s11] sm:$0x1]  ;;  %s373_s12 = scalar_lea.vmem [#allocation5], %s589_s27 }
  0x56   :  { %v343_v59 = vadd.f32 %v342_v52, %v338_v54  ;;  %v365_v61 = vadd.f32 %v364_v58, %v360_v57  ;;  %v374_v63 = vld [vmem:[%s373_s12] sm:$0x1]  ;;  %s378_s8 = scalar_lea.vmem [#allocation5], %s590_s1 }
  0x57   :  { %v379_v1 = vld [vmem:[%s378_s8] sm:$0x1]  ;;  %s383_s13 = scalar_lea.vmem [#allocation5], %s591_s5 }
  0x58   :  { %v348_v62 = vadd.f32 %v347_v56, %v343_v59  ;;  %v370_v0 = vadd.f32 %v369_v60, %v365_v61  ;;  %v384_v3 = vld [vmem:[%s383_s13] sm:$0x1]  ;;  %s388_s14 = scalar_lea.vmem [#allocation5], %s592_s7 }
  0x59   :  { %v389_v5 = vld [vmem:[%s388_s14] sm:$0x1] }
  0x5a   :  { %349 = vst [vmem:[#allocation2 + $0x6] sm:$0x1] %v348_v62  ;;  %v375_v2 = vadd.f32 %v374_v63, %v370_v0  ;;  %v599_v11 = vld [vmem:[%s847_s3] ss:$0 sm:$0xff]  ;;  %s455_s3 = sshll.u32 %s848_s4, 4  ;;  %s456_s3 = int_to_ptr.hbm [resolvable:$true] %s455_s3 }
  0x5c   :  { %v380_v4 = vadd.f32 %v379_v1, %v375_v2 }
  0x5e   :  { %v385_v6 = vadd.f32 %v384_v3, %v380_v4 }
  0x60   :  { %v390_v7 = vadd.f32 %v389_v5, %v385_v6 }
  0x62   :  { %391 = vst [vmem:[#allocation2 + $0x7] sm:$0x1] %v390_v7 }
  0x69   :  { %v392_v8 = vld [vmem:[#allocation2] sm:$0xff] }
  0x6a   :  { %429 = vmatmul.f32.vlgmr.msra.gmra.mxu0 %v392_v8 }
  0xe7   :  { %v430_v12 = vpop.f32.mrf.mxu0 }
  0xe8   :  { %v431_v13 = vadd.f32 %v599_v11, %v430_v12 }
  0xea   :  { %v436_v14 = vsel %vm435_vm0, %v431_v13, -1e+30 }
  0xeb   :  { %437 = vmax.xlane.f32.xlu0 %v436_v14 }
 0x15e   :  { %v438_v15 = vpop.xlane.xlu0 %437 }
 0x15f   :  { %v439_v16 = vsub.f32 %v436_v14, %v438_v15 }
 0x161   :  { %v440_v17 = vmul.f32 1.442695, %v439_v16 }
 0x163   :  { %600 = vpow2.f32 %v440_v17 }
 0x169   :  { %v601_v18 = vpop.eup %600 }
 0x16a   :  { %442 = vadd.xlane.f32.xlu0 %v601_v18 }
 0x1dd   :  { %v443_v19 = vpop.xlane.xlu0 %442 }
 0x1de   :  { %602 = vlog2.f32 %v443_v19 }
 0x1e4   :  { %v603_v20 = vpop.eup %602 }
 0x1e5   :  { %v445_v21 = vmul.f32 0.6931472, %v603_v20 }
 0x1e7   :  { %v446_v22 = vsub.f32 %v439_v16, %v445_v21 }
 0x1e9   :  { %447 = vst [vmem:[#allocation10] sm:$0xff] %v446_v22 }
 0x1ea   :  { %458 = dma.vmem_to_hbm [thread:$0]  %s454_s17, 128, %s456_s3, [#allocation7]  }
 0x1eb   :  { %694 = dma.done.wait [#allocation7], 128  }
 0x1ec   :  { %695 = vsyncadd [#allocation7], 4294967168 }
 0x1ed   :  { %463 = vsyncpa [#allocation6], 1 }
 0x1ee   :  { %464 = vsyncpa [#allocation9], 1 }
 0x1ef   :  { %465 = vsyncpa [#allocation7], 1 }

</bundles_post_ra>
